<compile_context>
chip_gen: v7x
topology: tpu7x:2x2x1
jax: 0.10.0
libtpu: 0.0.40
codegen_flags: <defaults>
</compile_context>

<pallas_src>
import functools

import jax
import jax.numpy as jnp
from jax.experimental import pallas as pl
from jax.experimental.pallas import tpu as pltpu

EPS = 1e-5


# ----------------------------------------------------------------------------
# Kernel
# ----------------------------------------------------------------------------
def _bn_relu_packed(a, pool, gamma, beta, inv_count):
    """Batch-stat BN + ReLU in the lane-packed (N*H, W*C) layout.

    `pool` = kron(ones(W,W), eye(C)): a single matmul both pools the per-(w,c)
    column sums over W and broadcasts the per-channel result back to every
    (w, c) lane, so no lane<->sublane relayout is needed.
    """
    col_sum = jnp.sum(a, axis=0, keepdims=True)                    # (1, W*C)
    col_sq = jnp.sum(a * a, axis=0, keepdims=True)                 # (1, W*C)
    tot_sum = jnp.dot(col_sum, pool, preferred_element_type=jnp.float32)
    tot_sq = jnp.dot(col_sq, pool, preferred_element_type=jnp.float32)
    mean = tot_sum * inv_count
    var = tot_sq * inv_count - mean * mean                         # biased var
    scale = gamma * jax.lax.rsqrt(var + EPS)
    shift = beta - mean * scale
    return jnp.maximum(a * scale + shift, 0.0)


def _conv3x3_packed(a, w_ref, s_up, s_dn, bias):
    """3x3 conv (padding=1) in the packed layout.

    w_ref[dh] is a (W*Ci, W*Co) block-tridiagonal slab folding the kernel
    column (dw) shifts, W zero-padding and channel mixing of kernel row dh.
    s_up / s_dn are 0/1 (N*H, N*H) matrices shifting rows by -1/+1 inside each
    image (H zero-padding folded in) -> the whole conv is 5 MXU matmuls.
    """
    a_up = jnp.dot(s_up, a, preferred_element_type=jnp.float32)    # row h-1
    a_dn = jnp.dot(s_dn, a, preferred_element_type=jnp.float32)    # row h+1
    out = jnp.dot(a_up, w_ref[0], preferred_element_type=jnp.float32)
    out = out + jnp.dot(a, w_ref[1], preferred_element_type=jnp.float32)
    out = out + jnp.dot(a_dn, w_ref[2], preferred_element_type=jnp.float32)
    return out + bias


def resblock_kernel(xp_ref, m1_ref, m2_ref, s_ref, w1_ref, w2_ref, ws_ref,
                    pin_ref, pout_ref, o_ref, *, inv_count):
    xp = xp_ref[...]                                   # (N*H, W*Cin)
    s_up = s_ref[0]
    s_dn = s_ref[1]

    g1, be1 = pin_ref[0:1, :], pin_ref[1:2, :]         # packed (1, W*Cin)
    b1, b2, bsk = pout_ref[0:1, :], pout_ref[1:2, :], pout_ref[2:3, :]
    g2, be2 = pout_ref[3:4, :], pout_ref[4:5, :]       # packed (1, W*Cout)

    # ---- BN1 + ReLU -> Conv1 ----
    h1 = _bn_relu_packed(xp, m1_ref[...], g1, be1, inv_count)
    c1 = _conv3x3_packed(h1, w1_ref, s_up, s_dn, b1)   # (N*H, W*Cout)

    # ---- BN2 + ReLU -> Conv2 ----
    h2 = _bn_relu_packed(c1, m2_ref[...], g2, be2, inv_count)
    c2 = _conv3x3_packed(h2, w2_ref, s_up, s_dn, b2)

    # ---- 1x1 skip on the raw input + residual add ----
    skip = jnp.dot(xp, ws_ref[...], preferred_element_type=jnp.float32) + bsk
    o_ref[...] = c2 + skip                             # (N*H, W*Cout) lane-dense


# ----------------------------------------------------------------------------
# Wrapper-side packing (tiny, pure-JAX, outside the kernel)
# ----------------------------------------------------------------------------
def _pack_conv3x3(w_hwio, W):
    """(3,3,Ci,Co) HWIO -> (3, W*Ci, W*Co) block-tridiagonal weight slabs."""
    _, _, ci, co = w_hwio.shape
    wi = jnp.arange(W)[:, None]           # input column index
    wo = jnp.arange(W)[None, :]           # output column index
    dw = wi - wo + 1                      # kernel column index
    valid = (dw >= 0) & (dw <= 2)
    b = w_hwio[:, jnp.clip(dw, 0, 2)]     # (3, W, W, ci, co)
    b = jnp.where(valid[None, :, :, None, None], b, 0.0)
    return jnp.transpose(b, (0, 1, 3, 2, 4)).reshape(3, W * ci, W * co)


def _row_shift_matrices(N, H):
    """0/1 matrices shifting rows of the (N*H, .) slab by -1/+1 within an image."""
    r = jnp.arange(N * H)
    h = r % H
    up = (r[:, None] - 1 == r[None, :]) & (h >= 1)[:, None]
    dn = (r[:, None] + 1 == r[None, :]) & (h <= H - 2)[:, None]
    return jnp.stack([up, dn]).astype(jnp.float32)       # (2, N*H, N*H)


def resblock_forward(x_nchw, params):
    """x_nchw: (N, Cin, H, W) float32.  Returns (N, Cout, H, W) float32."""
    N, Cin, H, W = x_nchw.shape
    Cout = params["w1"].shape[-1]
    WCin, WCout, NH = W * Cin, W * Cout, N * H

    # NCHW -> NHWC -> lane-packed (N*H, W*Cin)
    xp = jnp.transpose(x_nchw, (0, 2, 3, 1)).reshape(NH, WCin)

    # Packed conv weights / BN pooling matrices / row-shift matrices.
    w1p = _pack_conv3x3(params["w1"], W)                            # (3, WCin, WCout)
    w2p = _pack_conv3x3(params["w2"], W)                            # (3, WCout, WCout)
    wsp = jnp.kron(jnp.eye(W, dtype=jnp.float32), params["ws"])     # (WCin, WCout)
    m1 = jnp.kron(jnp.ones((W, W), jnp.float32), jnp.eye(Cin, dtype=jnp.float32))
    m2 = jnp.kron(jnp.ones((W, W), jnp.float32), jnp.eye(Cout, dtype=jnp.float32))
    smat = _row_shift_matrices(N, H)

    # Per-channel vectors packed across W into two lane-dense slabs (2 DMAs).
    pin = jnp.stack([jnp.tile(params["g1"], W), jnp.tile(params["be1"], W)])
    pout = jnp.stack([jnp.tile(params["b1"], W), jnp.tile(params["b2"], W),
                      jnp.tile(params["bs"], W), jnp.tile(params["g2"], W),
                      jnp.tile(params["be2"], W)])

    vmem = pl.BlockSpec(memory_space=pltpu.MemorySpace.VMEM)
    kern = functools.partial(resblock_kernel, inv_count=1.0 / (N * H * W))
    out_packed = pl.pallas_call(
        kern,
        out_shape=jax.ShapeDtypeStruct((NH, WCout), jnp.float32),
        in_specs=[vmem] * 9,
        out_specs=vmem,
    )(xp, m1, m2, smat, w1p, w2p, wsp, pin, pout)

    # (N*H, W*Cout) -> NHWC -> NCHW
    return jnp.transpose(out_packed.reshape(N, H, W, Cout), (0, 3, 1, 2))


# ----------------------------------------------------------------------------
# Independent pure-JAX reference (lax conv) for validation
# ----------------------------------------------------------------------------
def resblock_reference_nhwc(x, p):
    def bn_relu(t, g, b):
        mean = jnp.mean(t, axis=(0, 1, 2), keepdims=True)
        var = jnp.mean(jnp.square(t - mean), axis=(0, 1, 2), keepdims=True)
        y = (t - mean) * jax.lax.rsqrt(var + EPS) * g.reshape(1, 1, 1, -1)
        return jnp.maximum(y + b.reshape(1, 1, 1, -1), 0.0)

    def conv(t, w, b, pad):
        y = jax.lax.conv_general_dilated(
            t, w, window_strides=(1, 1), padding=[(pad, pad), (pad, pad)],
            dimension_numbers=("NHWC", "HWIO", "NHWC"))
        return y + b.reshape(1, 1, 1, -1)

    h = bn_relu(x, p["g1"], p["be1"])
    h = conv(h, p["w1"], p["b1"], 1)
    h = bn_relu(h, p["g2"], p["be2"])
    h = conv(h, p["w2"], p["b2"], 1)
    s = conv(x, p["ws"].reshape(1, 1, *p["ws"].shape), p["bs"], 0)
    return h + s


def make_params(key, in_c, out_c):
    ks = jax.random.split(key, 10)
    scale = 0.1
    return {
        # BN1 / BN2 affine params
        "g1": 1.0 + scale * jax.random.normal(ks[0], (in_c,), jnp.float32),
        "be1": scale * jax.random.normal(ks[1], (in_c,), jnp.float32),
        "g2": 1.0 + scale * jax.random.normal(ks[2], (out_c,), jnp.float32),
        "be2": scale * jax.random.normal(ks[3], (out_c,), jnp.float32),
        # Conv2d(in_c, out_c, 3) -> HWIO
        "w1": scale * jax.random.normal(ks[4], (3, 3, in_c, out_c), jnp.float32),
        "b1": scale * jax.random.normal(ks[5], (out_c,), jnp.float32),
        # Conv2d(out_c, out_c, 3) -> HWIO
        "w2": scale * jax.random.normal(ks[6], (3, 3, out_c, out_c), jnp.float32),
        "b2": scale * jax.random.normal(ks[7], (out_c,), jnp.float32),
        # Conv2d(in_c, out_c, 1) skip
        "ws": scale * jax.random.normal(ks[8], (in_c, out_c), jnp.float32),
        "bs": scale * jax.random.normal(ks[9], (out_c,), jnp.float32),
    }


if __name__ == "__main__":
    key = jax.random.PRNGKey(0)
    N, Cin, Cout, H, W = 2, 4, 8, 16, 16

    kx, kp = jax.random.split(key)
    x = jax.random.normal(kx, (N, Cin, H, W), jnp.float32)   # PyTorch NCHW input
    params = make_params(kp, Cin, Cout)

    out = jax.block_until_ready(resblock_forward(x, params))
    assert out.shape == (N, Cout, H, W), out.shape

    # Validate against an independent lax.conv reference.
    ref = resblock_reference_nhwc(jnp.transpose(x, (0, 2, 3, 1)), params)
    ref = jnp.transpose(ref, (0, 3, 1, 2))
    max_err = float(jnp.max(jnp.abs(out - ref)))
    assert max_err < 1e-3, f"max abs error vs reference: {max_err}"

    print("KERNEL_OK")
</pallas_src>

<mosaic_0001>
module attributes {stable_mosaic.version = 11 : i64} {
  func.func @resblock_kernel(%arg0: memref<32x64xf32, #tpu.memory_space<vmem>>, %arg1: memref<64x64xf32, #tpu.memory_space<vmem>>, %arg2: memref<128x128xf32, #tpu.memory_space<vmem>>, %arg3: memref<2x32x32xf32, #tpu.memory_space<vmem>>, %arg4: memref<3x64x128xf32, #tpu.memory_space<vmem>>, %arg5: memref<3x128x128xf32, #tpu.memory_space<vmem>>, %arg6: memref<64x128xf32, #tpu.memory_space<vmem>>, %arg7: memref<2x64xf32, #tpu.memory_space<vmem>>, %arg8: memref<5x128xf32, #tpu.memory_space<vmem>>, %arg9: memref<32x128xf32, #tpu.memory_space<vmem>>) attributes {dimension_semantics = [], scalar_prefetch = 0 : i64, scratch_operands = 0 : i64, tpu.core_type = #tpu.core_type<tc>} {
    %c0 = arith.constant 0 : index
    %c0_0 = arith.constant 0 : index
    %0 = vector.load %arg0[%c0, %c0_0] : memref<32x64xf32, #tpu.memory_space<vmem>>, vector<32x64xf32>
    %c0_1 = arith.constant 0 : index
    %c0_2 = arith.constant 0 : index
    %c0_3 = arith.constant 0 : index
    %1 = vector.load %arg3[%c0_1, %c0_2, %c0_3] : memref<2x32x32xf32, #tpu.memory_space<vmem>>, vector<1x32x32xf32>
    %2 = vector.shape_cast %1 : vector<1x32x32xf32> to vector<32x32xf32>
    %c1 = arith.constant 1 : index
    %c0_4 = arith.constant 0 : index
    %c0_5 = arith.constant 0 : index
    %3 = vector.load %arg3[%c1, %c0_4, %c0_5] : memref<2x32x32xf32, #tpu.memory_space<vmem>>, vector<1x32x32xf32>
    %4 = vector.shape_cast %3 : vector<1x32x32xf32> to vector<32x32xf32>
    %c0_6 = arith.constant 0 : index
    %c0_7 = arith.constant 0 : index
    %5 = vector.load %arg7[%c0_6, %c0_7] : memref<2x64xf32, #tpu.memory_space<vmem>>, vector<1x64xf32>
    %c1_8 = arith.constant 1 : index
    %c0_9 = arith.constant 0 : index
    %6 = vector.load %arg7[%c1_8, %c0_9] : memref<2x64xf32, #tpu.memory_space<vmem>>, vector<1x64xf32>
    %c0_10 = arith.constant 0 : index
    %c0_11 = arith.constant 0 : index
    %7 = vector.load %arg8[%c0_10, %c0_11] : memref<5x128xf32, #tpu.memory_space<vmem>>, vector<1x128xf32>
    %c1_12 = arith.constant 1 : index
    %c0_13 = arith.constant 0 : index
    %8 = vector.load %arg8[%c1_12, %c0_13] : memref<5x128xf32, #tpu.memory_space<vmem>>, vector<1x128xf32>
    %c2 = arith.constant 2 : index
    %c0_14 = arith.constant 0 : index
    %9 = vector.load %arg8[%c2, %c0_14] : memref<5x128xf32, #tpu.memory_space<vmem>>, vector<1x128xf32>
    %c3 = arith.constant 3 : index
    %c0_15 = arith.constant 0 : index
    %10 = vector.load %arg8[%c3, %c0_15] : memref<5x128xf32, #tpu.memory_space<vmem>>, vector<1x128xf32>
    %c4 = arith.constant 4 : index
    %c0_16 = arith.constant 0 : index
    %11 = vector.load %arg8[%c4, %c0_16] : memref<5x128xf32, #tpu.memory_space<vmem>>, vector<1x128xf32>
    %c0_17 = arith.constant 0 : index
    %c0_18 = arith.constant 0 : index
    %12 = vector.load %arg1[%c0_17, %c0_18] : memref<64x64xf32, #tpu.memory_space<vmem>>, vector<64x64xf32>
    %cst = arith.constant dense<0.000000e+00> : vector<64xf32>
    %13 = vector.multi_reduction <add>, %0, %cst [0] : vector<32x64xf32> to vector<64xf32>
    %14 = vector.shape_cast %13 : vector<64xf32> to vector<1x64xf32>
    %15 = arith.mulf %0, %0 : vector<32x64xf32>
    %cst_19 = arith.constant dense<0.000000e+00> : vector<64xf32>
    %16 = vector.multi_reduction <add>, %15, %cst_19 [0] : vector<32x64xf32> to vector<64xf32>
    %17 = vector.shape_cast %16 : vector<64xf32> to vector<1x64xf32>
    %cst_20 = arith.constant dense<0.000000e+00> : vector<1x64xf32>
    %18 = tpu.matmul %14, %12, %cst_20 {dimension_numbers = #tpu.dot_dimension_numbers<[1], [0], [0], [1], [0, 0, 1, 1], [], []>} : vector<1x64xf32>, vector<64x64xf32>, vector<1x64xf32> -> vector<1x64xf32>
    %cst_21 = arith.constant dense<0.000000e+00> : vector<1x64xf32>
    %19 = tpu.matmul %17, %12, %cst_21 {dimension_numbers = #tpu.dot_dimension_numbers<[1], [0], [0], [1], [0, 0, 1, 1], [], []>} : vector<1x64xf32>, vector<64x64xf32>, vector<1x64xf32> -> vector<1x64xf32>
    %cst_22 = arith.constant 0.001953125 : f32
    %20 = vector.broadcast %cst_22 : f32 to vector<1x64xf32>
    %21 = arith.mulf %18, %20 : vector<1x64xf32>
    %cst_23 = arith.constant 0.001953125 : f32
    %22 = vector.broadcast %cst_23 : f32 to vector<1x64xf32>
    %23 = arith.mulf %19, %22 : vector<1x64xf32>
    %24 = arith.mulf %21, %21 : vector<1x64xf32>
    %25 = arith.subf %23, %24 : vector<1x64xf32>
    %cst_24 = arith.constant 9.99999974E-6 : f32
    %26 = vector.broadcast %cst_24 : f32 to vector<1x64xf32>
    %27 = arith.addf %25, %26 : vector<1x64xf32>
    %28 = math.rsqrt %27 : vector<1x64xf32>
    %29 = arith.mulf %5, %28 : vector<1x64xf32>
    %30 = arith.mulf %21, %29 : vector<1x64xf32>
    %31 = arith.subf %6, %30 : vector<1x64xf32>
    %32 = vector.broadcast %29 : vector<1x64xf32> to vector<32x64xf32>
    %33 = arith.mulf %0, %32 : vector<32x64xf32>
    %34 = vector.broadcast %31 : vector<1x64xf32> to vector<32x64xf32>
    %35 = arith.addf %33, %34 : vector<32x64xf32>
    %cst_25 = arith.constant 0.000000e+00 : f32
    %36 = vector.broadcast %cst_25 : f32 to vector<32x64xf32>
    %37 = arith.maximumf %35, %36 : vector<32x64xf32>
    %cst_26 = arith.constant dense<0.000000e+00> : vector<32x64xf32>
    %38 = tpu.matmul %2, %37, %cst_26 {dimension_numbers = #tpu.dot_dimension_numbers<[1], [0], [0], [1], [0, 0, 1, 1], [], []>} : vector<32x32xf32>, vector<32x64xf32>, vector<32x64xf32> -> vector<32x64xf32>
    %cst_27 = arith.constant dense<0.000000e+00> : vector<32x64xf32>
    %39 = tpu.matmul %4, %37, %cst_27 {dimension_numbers = #tpu.dot_dimension_numbers<[1], [0], [0], [1], [0, 0, 1, 1], [], []>} : vector<32x32xf32>, vector<32x64xf32>, vector<32x64xf32> -> vector<32x64xf32>
    %c0_28 = arith.constant 0 : index
    %c0_29 = arith.constant 0 : index
    %c0_30 = arith.constant 0 : index
    %40 = vector.load %arg4[%c0_28, %c0_29, %c0_30] : memref<3x64x128xf32, #tpu.memory_space<vmem>>, vector<1x64x128xf32>
    %41 = vector.shape_cast %40 : vector<1x64x128xf32> to vector<64x128xf32>
    %cst_31 = arith.constant dense<0.000000e+00> : vector<32x128xf32>
    %42 = tpu.matmul %38, %41, %cst_31 {dimension_numbers = #tpu.dot_dimension_numbers<[1], [0], [0], [1], [0, 0, 1, 1], [], []>} : vector<32x64xf32>, vector<64x128xf32>, vector<32x128xf32> -> vector<32x128xf32>
    %c1_32 = arith.constant 1 : index
    %c0_33 = arith.constant 0 : index
    %c0_34 = arith.constant 0 : index
    %43 = vector.load %arg4[%c1_32, %c0_33, %c0_34] : memref<3x64x128xf32, #tpu.memory_space<vmem>>, vector<1x64x128xf32>
    %44 = vector.shape_cast %43 : vector<1x64x128xf32> to vector<64x128xf32>
    %cst_35 = arith.constant dense<0.000000e+00> : vector<32x128xf32>
    %45 = tpu.matmul %37, %44, %cst_35 {dimension_numbers = #tpu.dot_dimension_numbers<[1], [0], [0], [1], [0, 0, 1, 1], [], []>} : vector<32x64xf32>, vector<64x128xf32>, vector<32x128xf32> -> vector<32x128xf32>
    %46 = arith.addf %42, %45 : vector<32x128xf32>
    %c2_36 = arith.constant 2 : index
    %c0_37 = arith.constant 0 : index
    %c0_38 = arith.constant 0 : index
    %47 = vector.load %arg4[%c2_36, %c0_37, %c0_38] : memref<3x64x128xf32, #tpu.memory_space<vmem>>, vector<1x64x128xf32>
    %48 = vector.shape_cast %47 : vector<1x64x128xf32> to vector<64x128xf32>
    %cst_39 = arith.constant dense<0.000000e+00> : vector<32x128xf32>
    %49 = tpu.matmul %39, %48, %cst_39 {dimension_numbers = #tpu.dot_dimension_numbers<[1], [0], [0], [1], [0, 0, 1, 1], [], []>} : vector<32x64xf32>, vector<64x128xf32>, vector<32x128xf32> -> vector<32x128xf32>
    %50 = arith.addf %46, %49 : vector<32x128xf32>
    %51 = vector.broadcast %7 : vector<1x128xf32> to vector<32x128xf32>
    %52 = arith.addf %50, %51 : vector<32x128xf32>
    %c0_40 = arith.constant 0 : index
    %c0_41 = arith.constant 0 : index
    %53 = vector.load %arg2[%c0_40, %c0_41] : memref<128x128xf32, #tpu.memory_space<vmem>>, vector<128x128xf32>
    %cst_42 = arith.constant dense<0.000000e+00> : vector<128xf32>
    %54 = vector.multi_reduction <add>, %52, %cst_42 [0] : vector<32x128xf32> to vector<128xf32>
    %55 = vector.shape_cast %54 : vector<128xf32> to vector<1x128xf32>
    %56 = arith.mulf %52, %52 : vector<32x128xf32>
    %cst_43 = arith.constant dense<0.000000e+00> : vector<128xf32>
    %57 = vector.multi_reduction <add>, %56, %cst_43 [0] : vector<32x128xf32> to vector<128xf32>
    %58 = vector.shape_cast %57 : vector<128xf32> to vector<1x128xf32>
    %cst_44 = arith.constant dense<0.000000e+00> : vector<1x128xf32>
    %59 = tpu.matmul %55, %53, %cst_44 {dimension_numbers = #tpu.dot_dimension_numbers<[1], [0], [0], [1], [0, 0, 1, 1], [], []>} : vector<1x128xf32>, vector<128x128xf32>, vector<1x128xf32> -> vector<1x128xf32>
    %cst_45 = arith.constant dense<0.000000e+00> : vector<1x128xf32>
    %60 = tpu.matmul %58, %53, %cst_45 {dimension_numbers = #tpu.dot_dimension_numbers<[1], [0], [0], [1], [0, 0, 1, 1], [], []>} : vector<1x128xf32>, vector<128x128xf32>, vector<1x128xf32> -> vector<1x128xf32>
    %cst_46 = arith.constant 0.001953125 : f32
    %61 = vector.broadcast %cst_46 : f32 to vector<1x128xf32>
    %62 = arith.mulf %59, %61 : vector<1x128xf32>
    %cst_47 = arith.constant 0.001953125 : f32
    %63 = vector.broadcast %cst_47 : f32 to vector<1x128xf32>
    %64 = arith.mulf %60, %63 : vector<1x128xf32>
    %65 = arith.mulf %62, %62 : vector<1x128xf32>
    %66 = arith.subf %64, %65 : vector<1x128xf32>
    %cst_48 = arith.constant 9.99999974E-6 : f32
    %67 = vector.broadcast %cst_48 : f32 to vector<1x128xf32>
    %68 = arith.addf %66, %67 : vector<1x128xf32>
    %69 = math.rsqrt %68 : vector<1x128xf32>
    %70 = arith.mulf %10, %69 : vector<1x128xf32>
    %71 = arith.mulf %62, %70 : vector<1x128xf32>
    %72 = arith.subf %11, %71 : vector<1x128xf32>
    %73 = vector.broadcast %70 : vector<1x128xf32> to vector<32x128xf32>
    %74 = arith.mulf %52, %73 : vector<32x128xf32>
    %75 = vector.broadcast %72 : vector<1x128xf32> to vector<32x128xf32>
    %76 = arith.addf %74, %75 : vector<32x128xf32>
    %cst_49 = arith.constant 0.000000e+00 : f32
    %77 = vector.broadcast %cst_49 : f32 to vector<32x128xf32>
    %78 = arith.maximumf %76, %77 : vector<32x128xf32>
    %cst_50 = arith.constant dense<0.000000e+00> : vector<32x128xf32>
    %79 = tpu.matmul %2, %78, %cst_50 {dimension_numbers = #tpu.dot_dimension_numbers<[1], [0], [0], [1], [0, 0, 1, 1], [], []>} : vector<32x32xf32>, vector<32x128xf32>, vector<32x128xf32> -> vector<32x128xf32>
    %cst_51 = arith.constant dense<0.000000e+00> : vector<32x128xf32>
    %80 = tpu.matmul %4, %78, %cst_51 {dimension_numbers = #tpu.dot_dimension_numbers<[1], [0], [0], [1], [0, 0, 1, 1], [], []>} : vector<32x32xf32>, vector<32x128xf32>, vector<32x128xf32> -> vector<32x128xf32>
    %c0_52 = arith.constant 0 : index
    %c0_53 = arith.constant 0 : index
    %c0_54 = arith.constant 0 : index
    %81 = vector.load %arg5[%c0_52, %c0_53, %c0_54] : memref<3x128x128xf32, #tpu.memory_space<vmem>>, vector<1x128x128xf32>
    %82 = vector.shape_cast %81 : vector<1x128x128xf32> to vector<128x128xf32>
    %cst_55 = arith.constant dense<0.000000e+00> : vector<32x128xf32>
    %83 = tpu.matmul %79, %82, %cst_55 {dimension_numbers = #tpu.dot_dimension_numbers<[1], [0], [0], [1], [0, 0, 1, 1], [], []>} : vector<32x128xf32>, vector<128x128xf32>, vector<32x128xf32> -> vector<32x128xf32>
    %c1_56 = arith.constant 1 : index
    %c0_57 = arith.constant 0 : index
    %c0_58 = arith.constant 0 : index
    %84 = vector.load %arg5[%c1_56, %c0_57, %c0_58] : memref<3x128x128xf32, #tpu.memory_space<vmem>>, vector<1x128x128xf32>
    %85 = vector.shape_cast %84 : vector<1x128x128xf32> to vector<128x128xf32>
    %cst_59 = arith.constant dense<0.000000e+00> : vector<32x128xf32>
    %86 = tpu.matmul %78, %85, %cst_59 {dimension_numbers = #tpu.dot_dimension_numbers<[1], [0], [0], [1], [0, 0, 1, 1], [], []>} : vector<32x128xf32>, vector<128x128xf32>, vector<32x128xf32> -> vector<32x128xf32>
    %87 = arith.addf %83, %86 : vector<32x128xf32>
    %c2_60 = arith.constant 2 : index
    %c0_61 = arith.constant 0 : index
    %c0_62 = arith.constant 0 : index
    %88 = vector.load %arg5[%c2_60, %c0_61, %c0_62] : memref<3x128x128xf32, #tpu.memory_space<vmem>>, vector<1x128x128xf32>
    %89 = vector.shape_cast %88 : vector<1x128x128xf32> to vector<128x128xf32>
    %cst_63 = arith.constant dense<0.000000e+00> : vector<32x128xf32>
    %90 = tpu.matmul %80, %89, %cst_63 {dimension_numbers = #tpu.dot_dimension_numbers<[1], [0], [0], [1], [0, 0, 1, 1], [], []>} : vector<32x128xf32>, vector<128x128xf32>, vector<32x128xf32> -> vector<32x128xf32>
    %91 = arith.addf %87, %90 : vector<32x128xf32>
    %92 = vector.broadcast %8 : vector<1x128xf32> to vector<32x128xf32>
    %93 = arith.addf %91, %92 : vector<32x128xf32>
    %c0_64 = arith.constant 0 : index
    %c0_65 = arith.constant 0 : index
    %94 = vector.load %arg6[%c0_64, %c0_65] : memref<64x128xf32, #tpu.memory_space<vmem>>, vector<64x128xf32>
    %cst_66 = arith.constant dense<0.000000e+00> : vector<32x128xf32>
    %95 = tpu.matmul %0, %94, %cst_66 {dimension_numbers = #tpu.dot_dimension_numbers<[1], [0], [0], [1], [0, 0, 1, 1], [], []>} : vector<32x64xf32>, vector<64x128xf32>, vector<32x128xf32> -> vector<32x128xf32>
    %96 = vector.broadcast %9 : vector<1x128xf32> to vector<32x128xf32>
    %97 = arith.addf %95, %96 : vector<32x128xf32>
    %98 = arith.addf %93, %97 : vector<32x128xf32>
    %c0_67 = arith.constant 0 : index
    %c0_68 = arith.constant 0 : index
    %99 = vector.load %arg9[%c0_67, %c0_68] : memref<32x128xf32, #tpu.memory_space<vmem>>, vector<32x128xf32>
    tpu.vector_store %arg9[%c0_67, %c0_68], %98 {strides = array<i32>} : memref<32x128xf32, #tpu.memory_space<vmem>>, vector<32x128xf32>,
    return
  }
}

</mosaic_0001>

<bundles_post_ra>
// kernel: tpu_custom_call.1
= control target key start
LH: loop header
LB: loop body
LE: loop exit
PB: predicated region body
PF: predicated region fallthrough
CT: control target
= control target key end

     0   :  { %14 = vsyncpa [#allocation3], 0  ;;  %s3216_s0 = inlined_call_operand.hbm [shape: f32[32,64], index: 0, kind: input, shape index: {}]   ;;  %s3217_s1 = inlined_call_operand.hbm [shape: f32[64,64], index: 1, kind: input, shape index: {}]   ;;  %s3218_s2 = inlined_call_operand.hbm [shape: f32[128,128], index: 2, kind: input, shape index: {}]   ;;  %s3219_s3 = inlined_call_operand.hbm [shape: f32[2,32,32], index: 3, kind: input, shape index: {}]   ;;  %s3220_s4 = inlined_call_operand.hbm [shape: f32[3,64,128], index: 4, kind: input, shape index: {}]   ;;  %s3221_s5 = inlined_call_operand.hbm [shape: f32[3,128,128], index: 5, kind: input, shape index: {}]   ;;  %s3222_s6 = inlined_call_operand.hbm [shape: f32[64,128], index: 6, kind: input, shape index: {}]   ;;  %s3223_s7 = inlined_call_operand.vmem [shape: f32[2,64], index: 7, kind: input, shape index: {}]   ;;  %s3224_s8 = inlined_call_operand.vmem [shape: f32[5,128], index: 8, kind: input, shape index: {}]   ;;  %s3225_s9 = inlined_call_operand.hbm [shape: f32[32,128], index: 9, kind: output, shape index: {}]  }
   0x1   :  { %15 = vsyncpa [#allocation6], 0 }
   0x2   :  { %16 = vsyncpa [#allocation9], 0 }
   0x3   :  { %17 = vsyncpa [#allocation12], 0 }
   0x4   :  { %18 = vsyncpa [#allocation4], 0  ;;  %s2807_s30 = smov [#allocation5]   ;;  %s2808_s11 = smov [#allocation8]  }
   0x5   :  { %s36_s10 = sshll.u32 %s2807_s30, 4  ;;  %s60_s12 = sshll.u32 %s2808_s11, 4  ;;  %s37_s10 = int_to_ptr.vmem [resolvable:$true] %s36_s10  ;;  %s2870_s12 = int_to_ptr.vmem [resolvable:$true] %s60_s12 }
   0x6   :  { %s2621_s15 = scalar_lea.hbm %s3217_s1, 1024 }
   0x7   :  { %p2622_p0 = scmp.ne.s32.totalorder %s3217_s1, %s2621_s15  ;;  %p2625_p1 = scmp.lt.u32.totalorder %s2621_s15, %s3217_s1 }
   0x9   :  { %p2627_p2 = pnand %p2625_p1, %p2622_p0 }
   0xb   :  { %2630 = shalt.err (!%p2627_p2)
}
   0xc   :  { %s2631_s20 = scalar_lea.vmem %s37_s10, 1024  ;;  %p2636_p4 = scmp.lt.s32.totalorder %s37_s10, %s37_s10 }
   0xd   :  { %p2632_p3 = scmp.ne.s32.totalorder %s37_s10, %s2631_s20  ;;  %p2637_p5 = scmp.lt.s32.totalorder %s2631_s20, %s2631_s20 }
   0xf   :  { %p2638_p6 = por %p2637_p5, %p2636_p4 }
  0x11   :  { %p2639_p7 = pnand %p2638_p6, %p2632_p3 }
  0x13   :  { %2642 = shalt.err (!%p2639_p7)
}
  0x14   :  { %s2809_s21 = smov 128   ;;  %s2810_s22 = smov 8  }
  0x15   :  { %42 = dma.hbm_to_vmem [thread:$0]  %s3217_s1, 1024, %s37_s10, [#allocation6], %s2809_s21, %s2809_s21, %s2810_s22  }
  0x16   :  { %s2643_s27 = scalar_lea.hbm %s3219_s3, 1024 }
  0x17   :  { %p2644_p8 = scmp.ne.s32.totalorder %s3219_s3, %s2643_s27  ;;  %p2647_p9 = scmp.lt.u32.totalorder %s2643_s27, %s3219_s3 }
  0x19   :  { %p2649_p10 = pnand %p2647_p9, %p2644_p8 }
  0x1b   :  { %2652 = shalt.err (!%p2649_p10)
}
  0x1c   :  { %s2653_s13 = scalar_lea.vmem %s2870_s12, 1024  ;;  %p2658_p12 = scmp.lt.s32.totalorder %s2870_s12, %s2870_s12 }
  0x1d   :  { %p2654_p11 = scmp.ne.s32.totalorder %s2870_s12, %s2653_s13  ;;  %p2659_p13 = scmp.lt.s32.totalorder %s2653_s13, %s2653_s13 }
  0x1f   :  { %p2660_p0 = por %p2659_p13, %p2658_p12 }
  0x21   :  { %p2661_p1 = pnand %p2660_p0, %p2654_p11 }
  0x23   :  { %2664 = shalt.err (!%p2661_p1)
}
  0x24   :  { %66 = dma.hbm_to_vmem [thread:$0]  %s3219_s3, 1024, %s2870_s12, [#allocation9], %s2809_s21, %s2809_s21, %s2810_s22  }
  0x25   :  { %s2811_s14 = smov [#allocation11]   ;;  %s2812_s16 = smov [#allocation2]  }
  0x26   :  { %s84_s15 = sshll.u32 %s2811_s14, 4  ;;  %s24_s17 = sshll.u32 %s2812_s16, 4  ;;  %s85_s15 = int_to_ptr.vmem [resolvable:$true] %s84_s15  ;;  %s2907_s17 = int_to_ptr.vmem [resolvable:$true] %s24_s17 }
  0x27   :  { %s2665_s20 = scalar_lea.hbm %s3221_s5, 6144 }
  0x28   :  { %p2666_p2 = scmp.ne.s32.totalorder %s3221_s5, %s2665_s20  ;;  %p2669_p3 = scmp.lt.u32.totalorder %s2665_s20, %s3221_s5 }
  0x2a   :  { %p2671_p4 = pnand %p2669_p3, %p2666_p2 }
  0x2c   :  { %2674 = shalt.err (!%p2671_p4)
}
  0x2d   :  { %s2675_s3 = scalar_lea.vmem %s85_s15, 6144  ;;  %p2680_p6 = scmp.lt.s32.totalorder %s85_s15, %s85_s15 }
  0x2e   :  { %p2676_p5 = scmp.ne.s32.totalorder %s85_s15, %s2675_s3  ;;  %p2681_p7 = scmp.lt.s32.totalorder %s2675_s3, %s2675_s3 }
  0x30   :  { %p2682_p8 = por %p2681_p7, %p2680_p6 }
  0x32   :  { %p2683_p9 = pnand %p2682_p8, %p2676_p5 }
  0x34   :  { %2686 = shalt.err (!%p2683_p9)
}
  0x35   :  { %90 = dma.hbm_to_vmem [thread:$0]  %s3221_s5, 6144, %s85_s15, [#allocation12], %s2809_s21, %s2809_s21, %s2810_s22  }
  0x36   :  { %s2687_s30 = scalar_lea.hbm %s3216_s0, 512 }
  0x37   :  { %p2688_p10 = scmp.ne.s32.totalorder %s3216_s0, %s2687_s30  ;;  %p2691_p11 = scmp.lt.u32.totalorder %s2687_s30, %s3216_s0 }
  0x39   :  { %p2693_p12 = pnand %p2691_p11, %p2688_p10 }
  0x3b   :  { %2696 = shalt.err (!%p2693_p12)
}
  0x3c   :  { %s2697_s14 = scalar_lea.vmem %s2907_s17, 512  ;;  %p2702_p0 = scmp.lt.s32.totalorder %s2907_s17, %s2907_s17 }
  0x3d   :  { %p2698_p13 = scmp.ne.s32.totalorder %s2907_s17, %s2697_s14  ;;  %p2703_p1 = scmp.lt.s32.totalorder %s2697_s14, %s2697_s14 }
  0x3f   :  { %p2704_p2 = por %p2703_p1, %p2702_p0 }
  0x41   :  { %p2705_p3 = pnand %p2704_p2, %p2698_p13 }
  0x43   :  { %2708 = shalt.err (!%p2705_p3)
}
  0x44   :  { %30 = dma.hbm_to_vmem [thread:$0]  %s3216_s0, 512, %s2907_s17, [#allocation3], %s2809_s21, %s2809_s21, %s2810_s22  }
  0x45   :  { %s2813_s16 = smov [#allocation7]   ;;  %s2814_s19 = smov [#allocation10]  }
  0x46   :  { %s48_s18 = sshll.u32 %s2813_s16, 4  ;;  %s72_s20 = sshll.u32 %s2814_s19, 4  ;;  %s49_s18 = int_to_ptr.vmem [resolvable:$true] %s48_s18  ;;  %s2944_s20 = int_to_ptr.vmem [resolvable:$true] %s72_s20 }
  0x47   :  { %s2709_s25 = scalar_lea.hbm %s3218_s2, 2048 }
  0x48   :  { %p2710_p4 = scmp.ne.s32.totalorder %s3218_s2, %s2709_s25  ;;  %p2713_p5 = scmp.lt.u32.totalorder %s2709_s25, %s3218_s2 }
  0x4a   :  { %p2715_p6 = pnand %p2713_p5, %p2710_p4 }
  0x4c   :  { %2718 = shalt.err (!%p2715_p6)
}
  0x4d   :  { %s2719_s0 = scalar_lea.vmem %s49_s18, 2048  ;;  %p2724_p8 = scmp.lt.s32.totalorder %s49_s18, %s49_s18 }
  0x4e   :  { %p2720_p7 = scmp.ne.s32.totalorder %s49_s18, %s2719_s0  ;;  %p2725_p9 = scmp.lt.s32.totalorder %s2719_s0, %s2719_s0 }
  0x50   :  { %p2726_p10 = por %p2725_p9, %p2724_p8 }
  0x52   :  { %p2727_p11 = pnand %p2726_p10, %p2720_p7 }
  0x54   :  { %2730 = shalt.err (!%p2727_p11)
}
  0x55   :  { %54 = dma.hbm_to_vmem [thread:$0]  %s3218_s2, 2048, %s49_s18, [#allocation6], %s2809_s21, %s2809_s21, %s2810_s22  }
  0x56   :  { %s2731_s11 = scalar_lea.hbm %s3220_s4, 3072 }
  0x57   :  { %p2732_p12 = scmp.ne.s32.totalorder %s3220_s4, %s2731_s11  ;;  %p2735_p13 = scmp.lt.u32.totalorder %s2731_s11, %s3220_s4 }
  0x59   :  { %p2737_p0 = pnand %p2735_p13, %p2732_p12 }
  0x5b   :  { %2740 = shalt.err (!%p2737_p0)
}
  0x5c   :  { %s2741_s5 = scalar_lea.vmem %s2944_s20, 3072  ;;  %p2746_p2 = scmp.lt.s32.totalorder %s2944_s20, %s2944_s20 }
  0x5d   :  { %p2742_p1 = scmp.ne.s32.totalorder %s2944_s20, %s2741_s5  ;;  %p2747_p3 = scmp.lt.s32.totalorder %s2741_s5, %s2741_s5 }
  0x5f   :  { %p2748_p4 = por %p2747_p3, %p2746_p2 }
  0x61   :  { %p2749_p5 = pnand %p2748_p4, %p2742_p1 }
  0x63   :  { %2752 = shalt.err (!%p2749_p5)
}
  0x64   :  { %78 = dma.hbm_to_vmem [thread:$0]  %s3220_s4, 3072, %s2944_s20, [#allocation9], %s2809_s21, %s2809_s21, %s2810_s22  }
  0x65   :  { %s2815_s16 = smov [#allocation13]   ;;  %s2753_s24 = scalar_lea.hbm %s3222_s6, 1024 }
  0x66   :  { %s96_s18 = sshll.u32 %s2815_s16, 4  ;;  %p2754_p6 = scmp.ne.s32.totalorder %s3222_s6, %s2753_s24  ;;  %s97_s18 = int_to_ptr.vmem [resolvable:$true] %s96_s18 }
  0x67   :  { %p2757_p7 = scmp.lt.u32.totalorder %s2753_s24, %s3222_s6 }
  0x69   :  { %p2759_p8 = pnand %p2757_p7, %p2754_p6 }
  0x6b   :  { %2762 = shalt.err (!%p2759_p8)
}
  0x6c   :  { %s2763_s27 = scalar_lea.vmem %s97_s18, 1024  ;;  %p2768_p10 = scmp.lt.s32.totalorder %s97_s18, %s97_s18 }
  0x6d   :  { %p2764_p9 = scmp.ne.s32.totalorder %s97_s18, %s2763_s27  ;;  %p2769_p11 = scmp.lt.s32.totalorder %s2763_s27, %s2763_s27 }
  0x6f   :  { %p2770_p12 = por %p2769_p11, %p2768_p10 }
  0x71   :  { %p2771_p13 = pnand %p2770_p12, %p2764_p9 }
  0x73   :  { %2774 = shalt.err (!%p2771_p13)
}
  0x74   :  { %102 = dma.hbm_to_vmem [thread:$0]  %s3222_s6, 1024, %s97_s18, [#allocation12], %s2809_s21, %s2809_s21, %s2810_s22  }
  0x75   :  { %2797 = dma.done.wait [#allocation3], 512  }
  0x76   :  { %2798 = vsyncadd [#allocation3], 4294966784 }
  0x77   :  { %2799 = dma.done.wait [#allocation6], 3072  }
  0x78   :  { %2800 = vsyncadd [#allocation6], 4294964224 }
  0x79   :  { %2801 = dma.done.wait [#allocation9], 4096  }
  0x7a   :  { %2802 = vsyncadd [#allocation9], 4294963200 }
  0x7b   :  { %2803 = dma.done.wait [#allocation12], 7168  }
  0x7c   :  { %2804 = vsyncadd [#allocation12], 4294960128  ;;  %v2816_v0 = vmov 0.0|0.0   ;;  %vm2817_vm0 = vmmov 0   ;;  %v2818_v1 = vmov 0.0   ;;  %v148_v2 = vld [vmem:[#allocation5] sm:$0xff] }
  0x7d   :  { %2312 = vmatprep.subr.bf16.mxu1 %v2816_v0  ;;  %1962 = vmatprep.mubr.msk.f32.mxu1 %vm2817_vm0, %v2818_v1  ;;  %v149_v3 = vld [vmem:[#allocation5 + $0x8] sm:$0xff]  ;;  %v150_v4 = vld [vmem:[#allocation5 + $0x10] sm:$0xff]  ;;  %vm156_vm1 = vcmask 523264   ;;  %v151_v6 = vld [vmem:[#allocation5 + $0x18] sm:$0xff]  ;;  %vm362_vm2 = vcmask 261120   ;;  %s2819_s15 = smov [#allocation14]  }
  0x7e   :  { %v2313_v5 = vpack.c.bf16 %v149_v3, %v148_v2  ;;  %v2999_v7 = vld [vmem:[#allocation2] sm:$0xff]  ;;  %v2316_v8 = vpack.c.bf16 %v151_v6, %v150_v4  ;;  %v3001_v9 = vld [vmem:[#allocation2 + $0x8] sm:$0xff]  ;;  %v3003_v10 = vld [vmem:[#allocation2 + $0x10] sm:$0xff]  ;;  %s1702_s16 = sshll.u32 %s2819_s15, 4  ;;  %s1703_s16 = int_to_ptr.vmem [resolvable:$true] %s1702_s16 }
  0x7f   :  { %v3005_v11 = vld [vmem:[#allocation2 + $0x18] sm:$0xff]  ;;  %v157_v12 = vsel %vm156_vm1, %v2999_v7, 0.0  ;;  %v170_v13 = vmul.f32 %v2999_v7, %v2999_v7  ;;  %v152_v14 = vld [vmem:[#allocation5 + $0x20] sm:$0xff]  ;;  %v153_v15 = vld [vmem:[#allocation5 + $0x28] sm:$0xff]  ;;  %v158_v16 = vsel %vm156_vm1, %v3001_v9, 0.0  ;;  %v160_v17 = vsel %vm156_vm1, %v3003_v10, 0.0  ;;  %p2780_p1 = scmp.lt.s32.totalorder %s1703_s16, %s1703_s16 }
  0x80   :  { %2314 = vmatpush3.bf16.msra.mxu1 %v2313_v5  ;;  %v171_v18 = vmul.f32 %v3001_v9, %v3001_v9  ;;  %v159_v19 = vadd.f32 %v158_v16, %v157_v12  ;;  %v172_v20 = vmul.f32 %v3003_v10, %v3003_v10  ;;  %v173_v21 = vmul.f32 %v3005_v11, %v3005_v11  ;;  %v154_v29 = vld [vmem:[#allocation5 + $0x30] sm:$0xff]  ;;  %v155_v30 = vld [vmem:[#allocation5 + $0x38] sm:$0xff]  ;;  %v566_v48 = vld [vmem:[#allocation10 + $0x40] sm:$0xff]  ;;  %s2775_s18 = scalar_lea.vmem %s1703_s16, 512 }
  0x81   :  { %2315 = vmatprep.subr.bf16.mxu1 %v2816_v0  ;;  %v174_v22 = vsel %vm156_vm1, %v170_v13, 0.0  ;;  %v162_v23 = vsel %vm156_vm1, %v3005_v11, 0.0  ;;  %v2319_v25 = vpack.c.bf16 %v153_v15, %v152_v14  ;;  %v2322_v34 = vpack.c.bf16 %v155_v30, %v154_v29  ;;  %v567_v49 = vld [vmem:[#allocation10 + $0x48] sm:$0xff]  ;;  %v568_v50 = vld [vmem:[#allocation10 + $0x50] sm:$0xff]  ;;  %v569_v52 = vld [vmem:[#allocation10 + $0x58] sm:$0xff]  ;;  %p2776_p0 = scmp.ne.s32.totalorder %s1703_s16, %s2775_s18  ;;  %p2781_p2 = scmp.lt.s32.totalorder %s2775_s18, %s2775_s18 }
  0x82   :  { %v175_v24 = vsel %vm156_vm1, %v171_v18, 0.0  ;;  %v161_v26 = vadd.f32 %v160_v17, %v159_v19  ;;  %v177_v28 = vsel %vm156_vm1, %v172_v20, 0.0  ;;  %v179_v31 = vsel %vm156_vm1, %v173_v21, 0.0  ;;  %v570_v54 = vld [vmem:[#allocation10 + $0x60] sm:$0xff]  ;;  %v571_v55 = vld [vmem:[#allocation10 + $0x68] sm:$0xff]  ;;  %v572_v57 = vld [vmem:[#allocation10 + $0x70] sm:$0xff] }
  0x83   :  { %v176_v27 = vadd.f32 %v175_v24, %v174_v22  ;;  %v2352_v51 = vpack.c.bf16 %v567_v49, %v566_v48  ;;  %v2356_v53 = vpack.c.bf16 %v569_v52, %v568_v50  ;;  %v2360_v56 = vpack.c.bf16 %v571_v55, %v570_v54  ;;  %v573_v58 = vld [vmem:[#allocation10 + $0x78] sm:$0xff]  ;;  %v3038_v60 = vld [vmem:[#allocation8] sm:$0xff]  ;;  %v558_v62 = vld [vmem:[#allocation10 + $0x8] sm:$0xff]  ;;  %p2782_p3 = por %p2781_p2, %p2780_p1 }
  0x84   :  { %2317 = vmatpush3.bf16.msra.mxu1 %v2316_v8  ;;  %v163_v32 = vadd.f32 %v162_v23, %v161_v26  ;;  %v2364_v59 = vpack.c.bf16 %v573_v58, %v572_v57  ;;  %v557_v61 = vld [vmem:[#allocation10] sm:$0xff]  ;;  %v342_v15 = vlaneseq  ;;  %v3060_v48 = vld [vmem:[#allocation8 + $0x8] sm:$0xff]  ;;  %v3062_v49 = vld [vmem:[#allocation8 + $0x10] sm:$0xff] }
  0x85   :  { %2318 = vmatprep.subr.bf16.mxu1 %v2816_v0  ;;  %v178_v33 = vadd.f32 %v177_v28, %v176_v27  ;;  %2353 = vmatprep.subr.bf16.mxu0 %v2352_v51  ;;  %v2368_v63 = vpack.c.bf16 %v558_v62, %v557_v61  ;;  %v141_v17 = vld [vmem:[%s3223_s7] sm:$0x1]  ;;  %v142_v21 = vld [vmem:[%s3223_s7 + $0x1] sm:$0x1]  ;;  %v3078_v54 = vld [vmem:[#allocation8 + $0x30] sm:$0xff]  ;;  %p2783_p4 = pnand %p2782_p3, %p2776_p0 }
  0x86   :  { %v164_v35 = vrot.slane %v163_v32, 4  ;;  %2355 = vmatpush3.bf16.msra.mxu0 %v2352_v51  ;;  %v343_v16 = vshrl.u32 %v342_v15, 7  ;;  %v3068_v51 = vld [vmem:[#allocation8 + $0x18] sm:$0xff]  ;;  %v3070_v52 = vld [vmem:[#allocation8 + $0x20] sm:$0xff]  ;;  %v770_v57 = vld [vmem:[#allocation10 + $0x88] sm:$0xff] }
  0x87   :  { %v180_v36 = vadd.f32 %v179_v31, %v178_v33  ;;  %2357 = vmatprep.subr.bf16.mxu0 %v2356_v53  ;;  %v3085_v55 = vld [vmem:[#allocation8 + $0x38] sm:$0xff]  ;;  %v887_v61 = vld [vmem:[#allocation7 + $0x8] sm:$0xff]  ;;  %v888_v62 = vld [vmem:[#allocation7 + $0x10] sm:$0xff] }
  0x88   :  { %2320 = vmatpush3.bf16.msra.mxu1 %v2319_v25  ;;  %v165_v37 = vadd.f32 %v164_v35, %v163_v32  ;;  %v3045_v18 = vsub.s32 0, %v343_v16  ;;  %v560_v35 = vld [vmem:[#allocation10 + $0x18] sm:$0xff] }
  0x89   :  { %2321 = vmatprep.subr.bf16.mxu1 %v2816_v0  ;;  %v181_v39 = vrot.slane %v180_v36, 4 }
  0x8a   :  { %v166_v38 = vrot.slane %v165_v37, 2  ;;  %2359 = vmatpush3.bf16.msra.mxu0 %v2356_v53  ;;  %v3076_v53 = vld [vmem:[#allocation8 + $0x28] sm:$0xff] }
  0x8b   :  { %v182_v42 = vadd.f32 %v181_v39, %v180_v36  ;;  %2361 = vmatprep.subr.bf16.mxu0 %v2360_v56 }
  0x8c   :  { %2323 = vmatpush3.bf16.msra.mxu1 %v2322_v34  ;;  %v167_v40 = vadd.f32 %v166_v38, %v165_v37 }
  0x8d   :  { %2324 = vmatprep.subr.bf16.mxu1 %v2816_v0  ;;  %v183_v44 = vrot.slane %v182_v42, 2 }
  0x8e   :  { %v168_v41 = vrot.slane %v167_v40, 1  ;;  %2363 = vmatpush3.bf16.msra.mxu0 %v2360_v56  ;;  %v769_v56 = vld [vmem:[#allocation10 + $0x80] sm:$0xff] }
  0x8f   :  { %v184_v45 = vadd.f32 %v183_v44, %v182_v42  ;;  %2365 = vmatprep.subr.bf16.mxu0 %v2364_v59  ;;  %v562_v44 = vld [vmem:[#allocation10 + $0x28] sm:$0xff]  ;;  %v2384_v58 = vpack.c.bf16 %v770_v57, %v769_v56 }
  0x90   :  { %v169_v43 = vadd.f32 %v168_v41, %v167_v40 }
  0x91   :  { %v185_v46 = vrot.slane %v184_v45, 1 }
  0x92   :  { %1963 = vmatmul.mubr.msk.f32.vlgmr.msra.gmra.mrb[0].mxu1 %vm156_vm1, %v169_v43  ;;  %2367 = vmatpush3.bf16.msra.mxu0 %v2364_v59  ;;  %v561_v43 = vld [vmem:[#allocation10 + $0x20] sm:$0xff] }
  0x93   :  { %2326 = vmatpush3.bf16.msra.mxu1 %v2313_v5  ;;  %1981 = vmatprep.mubr.msk.f32.mxu1 %vm2817_vm0, %v2818_v1  ;;  %v186_v47 = vadd.f32 %v185_v46, %v184_v45  ;;  %v2376_v45 = vpack.c.bf16 %v562_v44, %v561_v43  ;;  %v563_v46 = vld [vmem:[#allocation10 + $0x30] sm:$0xff]  ;;  %v886_v59 = vld [vmem:[#allocation7] sm:$0xff] }
  0x94   :  { %2327 = vmatprep.subr.bf16.mxu1 %v2816_v0  ;;  %2369 = vmatprep.subr.bf16.mxu0 %v2368_v63  ;;  %v1739_v43 = vld [vmem:[%s3224_s8] ss:$0 sm:$0xff] }
  0x97   :  { %2329 = vmatpush3.bf16.msra.mxu1 %v2316_v8 }
  0x98   :  { %2330 = vmatprep.subr.bf16.mxu1 %v2816_v0 }
  0x9b   :  { %2332 = vmatpush3.bf16.msra.mxu1 %v2319_v25 }
  0x9c   :  { %2333 = vmatprep.subr.bf16.mxu1 %v2816_v0 }
  0x9f   :  { %2335 = vmatpush3.bf16.msra.mxu1 %v2322_v34  ;;  %v559_v34 = vld [vmem:[#allocation10 + $0x10] sm:$0xff] }
  0xa0   :  { %v2372_v42 = vpack.c.bf16 %v560_v35, %v559_v34  ;;  %v896_v35 = vld [vmem:[#allocation7 + $0x50] sm:$0xff] }
  0xa2   :  { %1982 = vmatmul.mubr.msk.f32.vlgmr.msra.gmra.mrb[2].mxu1 %vm156_vm1, %v186_v47  ;;  %v564_v47 = vld [vmem:[#allocation10 + $0x38] sm:$0xff] }
  0xa3   :  { %1992 = vmatprep.mubr.msk.f32.mxu1 %vm362_vm2, %v3038_v60  ;;  %v2380_v50 = vpack.c.bf16 %v564_v47, %v563_v46 }
 0x165   :  { %v256_v2 = vpop.f32.mrb[0].mxu1 }
 0x166   :  { %v1964_v3 = vpop.f32.mrb[1].mxu1  ;;  %v333_v4 = vmul.f32 0.001953125, %v256_v2  ;;  %v889_v2 = vld [vmem:[#allocation7 + $0x18] sm:$0xff] }
 0x167   :  { %v3094_v3 = vpack.c.bf16 %v889_v2, %v888_v62 }
 0x168   :  { %v335_v6 = vmul.f32 %v333_v4, %v333_v4 }
 0x175   :  { %v329_v5 = vpop.f32.mrb[2].mxu1 }
 0x176   :  { %v334_v8 = vmul.f32 0.001953125, %v329_v5  ;;  %v1983_v12 = vpop.f32.mrb[3].mxu1  ;;  %v772_v5 = vld [vmem:[#allocation10 + $0x98] sm:$0xff] }
 0x178   :  { %v336_v13 = vsub.f32 %v334_v8, %v335_v6 }
 0x17a   :  { %v337_v14 = vadd.f32 1e-05, %v336_v13  ;;  %v773_v13 = vld [vmem:[#allocation10 + $0xa0] sm:$0xff] }
 0x17c   :  { %2617 = vrsqrt.f32 %v337_v14  ;;  %v774_v14 = vld [vmem:[#allocation10 + $0xa8] sm:$0xff] }
 0x186   :  { %v2618_v19 = vpop.eup %2617 }
 0x187   :  { %v339_v20 = vmul.f32 %v2618_v19, %v141_v17  ;;  %v2392_v17 = vpack.c.bf16 %v774_v14, %v773_v13  ;;  %v775_v19 = vld [vmem:[#allocation10 + $0xb0] sm:$0xff] }
 0x189   :  { %v340_v22 = vmul.f32 %v339_v20, %v333_v4  ;;  %v345_v23 = vrot.slane %v339_v20, %v3045_v18  ;;  %v771_v4 = vld [vmem:[#allocation10 + $0x90] sm:$0xff]  ;;  %v776_v20 = vld [vmem:[#allocation10 + $0xb8] sm:$0xff] }
 0x18a   :  { %v2388_v12 = vpack.c.bf16 %v772_v5, %v771_v4 }
 0x18b   :  { %v341_v24 = vsub.f32 %v142_v21, %v340_v22  ;;  %v346_v25 = vmul.f32 %v345_v23, %v2999_v7  ;;  %v347_v26 = vmul.f32 %v345_v23, %v3001_v9  ;;  %v348_v28 = vmul.f32 %v345_v23, %v3003_v10 }
 0x18c   :  { %v349_v29 = vmul.f32 %v345_v23, %v3005_v11  ;;  %v2396_v22 = vpack.c.bf16 %v776_v20, %v775_v19 }
 0x18d   :  { %v353_v27 = vrot.slane %v341_v24, %v3045_v18 }
 0x18f   :  { %v354_v30 = vadd.f32 %v353_v27, %v346_v25  ;;  %v355_v31 = vadd.f32 %v353_v27, %v347_v26  ;;  %v356_v32 = vadd.f32 %v353_v27, %v348_v28  ;;  %v357_v33 = vadd.f32 %v353_v27, %v349_v29  ;;  %v890_v26 = vld [vmem:[#allocation7 + $0x20] sm:$0xff]  ;;  %v891_v27 = vld [vmem:[#allocation7 + $0x28] sm:$0xff]  ;;  %v892_v29 = vld [vmem:[#allocation7 + $0x30] sm:$0xff] }
 0x190   :  { %v2407_v28 = vpack.c.bf16 %v891_v27, %v890_v26  ;;  %v1282_v27 = vld [vmem:[#allocation11 + $0x90] sm:$0xff] }
 0x191   :  { %v358_v36 = vmax.f32 %v354_v30, 0.0  ;;  %v359_v37 = vmax.f32 %v355_v31, 0.0  ;;  %v360_v38 = vmax.f32 %v356_v32, 0.0  ;;  %v361_v39 = vmax.f32 %v357_v33, 0.0  ;;  %v893_v30 = vld [vmem:[#allocation7 + $0x38] sm:$0xff]  ;;  %v894_v32 = vld [vmem:[#allocation7 + $0x40] sm:$0xff] }
 0x192   :  { %v2410_v31 = vpack.c.bf16 %v893_v30, %v892_v29  ;;  %v895_v33 = vld [vmem:[#allocation7 + $0x48] sm:$0xff]  ;;  %v1284_v30 = vld [vmem:[#allocation11 + $0xa0] sm:$0xff] }
 0x193   :  { %v2336_v40 = vpack.c.bf16 %v359_v37, %v358_v36  ;;  %2028 = vmatprep.mubr.msk.f32.mxu0 %vm156_vm1, %v358_v36  ;;  %v2340_v41 = vpack.c.bf16 %v361_v39, %v360_v38  ;;  %v2413_v34 = vpack.c.bf16 %v895_v33, %v894_v32  ;;  %v1287_v33 = vld [vmem:[#allocation11 + $0xb8] sm:$0xff] }
 0x194   :  { %2029 = vmatmul.mubr.msk.f32.vlgmr.msra.gmra.mrb[0].mxu0 %vm156_vm1, %v359_v37  ;;  %v898_v37 = vld [vmem:[#allocation7 + $0x60] sm:$0xff] }
 0x195   :  { %2337 = vmatprep.subr.bf16.mxu1 %v2336_v40  ;;  %2031 = vmatprep.mubr.msk.f32.mxu0 %vm156_vm1, %v360_v38  ;;  %v899_v38 = vld [vmem:[#allocation7 + $0x68] sm:$0xff] }
 0x196   :  { %2339 = vmatpush3.bf16.msra.mxu1 %v2336_v40  ;;  %2371 = vmatpush3.bf16.msra.mxu0 %v2368_v63  ;;  %v3091_v63 = vpack.c.bf16 %v887_v61, %v886_v59 }
 0x197   :  { %2341 = vmatprep.subr.bf16.mxu1 %v2340_v41  ;;  %2373 = vmatprep.subr.bf16.mxu0 %v2372_v42 }
 0x198   :  { %2032 = vmatmul.mubr.msk.f32.gmra.mrb[2].mxu0 %vm156_vm1, %v361_v39  ;;  %v2419_v39 = vpack.c.bf16 %v899_v38, %v898_v37  ;;  %v1290_v37 = vld [vmem:[#allocation11 + $0xd0] sm:$0xff]  ;;  %v1291_v38 = vld [vmem:[#allocation11 + $0xd8] sm:$0xff] }
 0x19a   :  { %2343 = vmatpush3.bf16.msra.mxu1 %v2340_v41  ;;  %2375 = vmatpush3.bf16.msra.mxu0 %v2372_v42 }
 0x19b   :  { %2345 = vmatprep.subr.bf16.mxu1 %v2336_v40  ;;  %2377 = vmatprep.subr.bf16.mxu0 %v2376_v45 }
 0x19d   :  { %1993 = vmatmul.mubr.msk.f32.vlgmr.msra.gmra.mrb[4].mxu1 %vm362_vm2, %v3060_v48 }
 0x19e   :  { %2347 = vmatpush3.bf16.msra.mxu1 %v2336_v40  ;;  %1995 = vmatprep.mubr.msk.f32.mxu1 %vm362_vm2, %v3062_v49  ;;  %v900_v40 = vld [vmem:[#allocation7 + $0x70] sm:$0xff] }
 0x19f   :  { %2349 = vmatprep.subr.bf16.mxu1 %v2340_v41  ;;  %2379 = vmatpush3.bf16.msra.mxu0 %v2376_v45 }
 0x1a0   :  { %2381 = vmatprep.subr.bf16.mxu0 %v2380_v50 }
 0x1a1   :  { %1996 = vmatmul.mubr.msk.f32.gmra.mrb[6].mxu1 %vm362_vm2, %v3068_v51 }
 0x1a2   :  { %2351 = vmatpush3.bf16.msra.mxu1 %v2340_v41  ;;  %2006 = vmatprep.mubr.msk.f32.mxu1 %vm362_vm2, %v3070_v52  ;;  %v901_v41 = vld [vmem:[#allocation7 + $0x78] sm:$0xff] }
 0x1a3   :  { %2383 = vmatpush3.bf16.msra.mxu0 %v2380_v50  ;;  %2400 = vmatprep.subr.bf16.mxu1 %v2816_v0  ;;  %v2422_v42 = vpack.c.bf16 %v901_v41, %v900_v40  ;;  %v1292_v40 = vld [vmem:[#allocation11 + $0xe0] sm:$0xff]  ;;  %v1293_v41 = vld [vmem:[#allocation11 + $0xe8] sm:$0xff] }
 0x1a4   :  { %2385 = vmatprep.subr.bf16.mxu0 %v2384_v58 }
 0x1a5   :  { %2007 = vmatmul.mubr.msk.f32.vlgmr.msra.gmra.mrb[8].mxu1 %vm362_vm2, %v3076_v53 }
 0x1a6   :  { %2009 = vmatprep.mubr.msk.f32.mxu1 %vm362_vm2, %v3078_v54  ;;  %2402 = vmatpush3.bf16.msra.mxu1 %v3091_v63 }
 0x1a7   :  { %2403 = vmatprep.subr.bf16.mxu1 %v2816_v0 }
 0x1a9   :  { %2010 = vmatmul.mubr.msk.f32.gmra.mrb[10].mxu1 %vm362_vm2, %v3085_v55 }
 0x1aa   :  { %2110 = vmatprep.mubr.msk.f32.mxu1 %vm2817_vm0, %v2818_v1  ;;  %2405 = vmatpush3.bf16.msra.mxu1 %v3094_v3 }
 0x1ab   :  { %2406 = vmatprep.subr.bf16.mxu1 %v2816_v0 }
 0x1ae   :  { %2408 = vmatpush3.bf16.msra.mxu1 %v2407_v28 }
 0x1af   :  { %2409 = vmatprep.subr.bf16.mxu1 %v2816_v0 }
 0x1b2   :  { %2411 = vmatpush3.bf16.msra.mxu1 %v2410_v31 }
 0x1b3   :  { %2412 = vmatprep.subr.bf16.mxu1 %v2816_v0 }
 0x1b6   :  { %2414 = vmatpush3.bf16.msra.mxu1 %v2413_v34 }
 0x1b7   :  { %2415 = vmatprep.subr.bf16.mxu1 %v2816_v0 }
 0x270   :  { %v1994_v6 = vpop.f32.mrb[4].mxu1 }
 0x271   :  { %v441_v8 = vpop.f32.mrb[5].mxu1 }
 0x272   :  { %2050 = vmatprep.mubr.msk.f32.mxu0 %vm156_vm1, %v441_v8 }
 0x273   :  { %2051 = vmatmul.mubr.msk.f32.vlgmr.msra.gmra.mrb[0].mxu0 %vm156_vm1, %v1994_v6 }
 0x274   :  { %2387 = vmatpush3.bf16.msra.mxu0 %v2384_v58  ;;  %v1997_v15 = vpop.f32.mrb[6].mxu1 }
 0x275   :  { %2389 = vmatprep.subr.bf16.mxu0 %v2388_v12  ;;  %v451_v16 = vpop.f32.mrb[7].mxu1 }
 0x276   :  { %2053 = vmatprep.mubr.msk.f32.mxu0 %vm156_vm1, %v451_v16 }
 0x277   :  { %2054 = vmatmul.mubr.msk.f32.gmra.mrb[2].mxu0 %vm156_vm1, %v1997_v15 }
 0x278   :  { %2391 = vmatpush3.bf16.msra.mxu0 %v2388_v12  ;;  %v2008_v21 = vpop.f32.mrb[8].mxu1 }
 0x279   :  { %2393 = vmatprep.subr.bf16.mxu0 %v2392_v17  ;;  %v538_v23 = vpop.f32.mrb[9].mxu1 }
 0x27a   :  { %2072 = vmatprep.mubr.msk.f32.mxu0 %vm156_vm1, %v538_v23 }
 0x27c   :  { %2395 = vmatpush3.bf16.msra.mxu0 %v2392_v17  ;;  %v2011_v24 = vpop.f32.mrb[10].mxu1 }
 0x27d   :  { %2397 = vmatprep.subr.bf16.mxu0 %v2396_v22  ;;  %v548_v25 = vpop.f32.mrb[11].mxu1 }
 0x280   :  { %2399 = vmatpush3.bf16.msra.mxu0 %v2396_v22 }
 0x283   :  { %2073 = vmatmul.mubr.msk.f32.vlgmr.msra.gmra.mrb[0].mxu0 %vm156_vm1, %v2008_v21 }
 0x284   :  { %2075 = vmatprep.mubr.msk.f32.mxu0 %vm156_vm1, %v548_v25  ;;  %v1281_v25 = vld [vmem:[#allocation11 + $0x88] sm:$0xff] }
 0x287   :  { %2076 = vmatmul.mubr.msk.f32.gmra.mrb[2].mxu0 %vm156_vm1, %v2011_v24  ;;  %v1280_v24 = vld [vmem:[#allocation11 + $0x80] sm:$0xff] }
 0x288   :  { %2156 = vmatprep.mubr.msk.f32.mxu0 %vm362_vm2, %v3038_v60  ;;  %v897_v60 = vld [vmem:[#allocation7 + $0x58] sm:$0xff]  ;;  %v2464_v26 = vpack.c.bf16 %v1281_v25, %v1280_v24 }
 0x289   :  { %v2416_v36 = vpack.c.bf16 %v897_v60, %v896_v35  ;;  %v1288_v35 = vld [vmem:[#allocation11 + $0xc0] sm:$0xff]  ;;  %v1289_v60 = vld [vmem:[#allocation11 + $0xc8] sm:$0xff] }
 0x28b   :  { %2417 = vmatpush3.bf16.msra.mxu1 %v2416_v36 }
 0x28c   :  { %2418 = vmatprep.subr.bf16.mxu1 %v2816_v0 }
 0x28f   :  { %2420 = vmatpush3.bf16.msra.mxu1 %v2419_v39 }
 0x290   :  { %2421 = vmatprep.subr.bf16.mxu1 %v2816_v0 }
 0x293   :  { %2423 = vmatpush3.bf16.msra.mxu1 %v2422_v42 }
 0x294   :  { %2424 = vmatprep.subr.bf16.mxu1 %v2816_v0 }
 0x356   :  { %v2074_v44 = vpop.f32.mrb[0].mxu0 }
 0x357   :  { %v855_v45 = vpop.f32.mrb[1].mxu0  ;;  %v3118_v46 = vadd.f32 %v2074_v44, %v1739_v43  ;;  %v1295_v44 = vld [vmem:[#allocation11 + $0xf8] sm:$0xff] }
 0x358   :  { %v3120_v47 = vadd.f32 %v1739_v43, %v855_v45 }
 0x359   :  { %v912_v8 = vmul.f32 %v3118_v46, %v3118_v46 }
 0x35a   :  { %v2077_v50 = vpop.f32.mrb[2].mxu0  ;;  %v902_v57 = vadd.f32 %v3118_v46, %v3120_v47  ;;  %v911_v12 = vmul.f32 %v3120_v47, %v3120_v47 }
 0x35b   :  { %v865_v56 = vpop.f32.mrb[3].mxu0  ;;  %v3126_v59 = vadd.f32 %v2077_v50, %v1739_v43 }
 0x35c   :  { %v3124_v58 = vadd.f32 %v1739_v43, %v865_v56  ;;  %v915_v16 = vadd.f32 %v912_v8, %v911_v12  ;;  %v2488_v43 = vpack.c.bf16 %v1293_v41, %v1292_v40  ;;  %v146_v8 = vld [vmem:[%s3224_s8 + $0x3] sm:$0x1] }
 0x35d   :  { %v914_v19 = vmul.f32 %v3126_v59, %v3126_v59  ;;  %v1467_v41 = vld [vmem:[#allocation11 + $0x100] sm:$0xff] }
 0x35e   :  { %v903_v61 = vadd.f32 %v902_v57, %v3124_v58  ;;  %v913_v14 = vmul.f32 %v3124_v58, %v3124_v58 }
 0x360   :  { %v904_v62 = vadd.f32 %v903_v61, %v3126_v59  ;;  %v916_v17 = vadd.f32 %v915_v16, %v913_v14  ;;  %v147_v14 = vld [vmem:[%s3224_s8 + $0x4] sm:$0x1] }
 0x362   :  { %v905_v2 = vrot.slane %v904_v62, 4  ;;  %v917_v20 = vadd.f32 %v916_v17, %v914_v19 }
 0x364   :  { %v906_v4 = vadd.f32 %v905_v2, %v904_v62  ;;  %v918_v21 = vrot.slane %v917_v20, 4 }
 0x366   :  { %v907_v5 = vrot.slane %v906_v4, 2 }
 0x368   :  { %v908_v6 = vadd.f32 %v907_v5, %v906_v4 }
 0x36a   :  { %v909_v13 = vrot.slane %v908_v6, 1 }
 0x36c   :  { %v910_v15 = vadd.f32 %v909_v13, %v908_v6 }
 0x36e   :  { %2111 = vmatmul.mubr.f32.vlgmr.msra.gmra.mrb[12].mxu1 %v910_v15 }
 0x36f   :  { %2426 = vmatpush3.bf16.msra.mxu1 %v3091_v63  ;;  %2145 = vmatprep.mubr.msk.f32.mxu1 %vm2817_vm0, %v2818_v1  ;;  %v919_v63 = vadd.f32 %v918_v21, %v917_v20 }
 0x370   :  { %2427 = vmatprep.subr.bf16.mxu1 %v2816_v0 }
 0x371   :  { %v920_v1 = vrot.slane %v919_v63, 2 }
 0x373   :  { %2429 = vmatpush3.bf16.msra.mxu1 %v3094_v3  ;;  %v921_v22 = vadd.f32 %v920_v1, %v919_v63 }
 0x374   :  { %2430 = vmatprep.subr.bf16.mxu1 %v2816_v0 }
 0x375   :  { %v922_v3 = vrot.slane %v921_v22, 1 }
 0x377   :  { %2432 = vmatpush3.bf16.msra.mxu1 %v2407_v28  ;;  %v923_v23 = vadd.f32 %v922_v3, %v921_v22  ;;  %v1283_v28 = vld [vmem:[#allocation11 + $0x98] sm:$0xff] }
 0x378   :  { %2433 = vmatprep.subr.bf16.mxu1 %v2816_v0  ;;  %v2468_v29 = vpack.c.bf16 %v1283_v28, %v1282_v27 }
 0x37b   :  { %2435 = vmatpush3.bf16.msra.mxu1 %v2410_v31  ;;  %v1285_v31 = vld [vmem:[#allocation11 + $0xa8] sm:$0xff] }
 0x37c   :  { %2436 = vmatprep.subr.bf16.mxu1 %v2816_v0  ;;  %v2472_v32 = vpack.c.bf16 %v1285_v31, %v1284_v30 }
 0x37f   :  { %2438 = vmatpush3.bf16.msra.mxu1 %v2413_v34 }
 0x380   :  { %2439 = vmatprep.subr.bf16.mxu1 %v2816_v0 }
 0x383   :  { %2441 = vmatpush3.bf16.msra.mxu1 %v2416_v36  ;;  %v2480_v36 = vpack.c.bf16 %v1289_v60, %v1288_v35  ;;  %v1274_v60 = vld [vmem:[#allocation11 + $0x58] sm:$0xff] }
 0x384   :  { %2442 = vmatprep.subr.bf16.mxu1 %v2816_v0 }
 0x387   :  { %2444 = vmatpush3.bf16.msra.mxu1 %v2419_v39  ;;  %v2484_v39 = vpack.c.bf16 %v1291_v38, %v1290_v37  ;;  %v1276_v37 = vld [vmem:[#allocation11 + $0x68] sm:$0xff] }
 0x388   :  { %2445 = vmatprep.subr.bf16.mxu1 %v2816_v0  ;;  %v1286_v0 = vld [vmem:[#allocation11 + $0xb0] sm:$0xff] }
 0x389   :  { %v2476_v34 = vpack.c.bf16 %v1287_v33, %v1286_v0  ;;  %v1268_v0 = vld [vmem:[#allocation11 + $0x28] sm:$0xff]  ;;  %v1270_v33 = vld [vmem:[#allocation11 + $0x38] sm:$0xff] }
 0x38b   :  { %2447 = vmatpush3.bf16.msra.mxu1 %v2422_v42  ;;  %v1294_v42 = vld [vmem:[#allocation11 + $0xf0] sm:$0xff] }
 0x38c   :  { %2465 = vmatprep.subr.bf16.mxu1 %v2464_v26  ;;  %v2492_v45 = vpack.c.bf16 %v1295_v44, %v1294_v42  ;;  %v1468_v42 = vld [vmem:[#allocation11 + $0x108] sm:$0xff] }
 0x38e   :  { %2146 = vmatmul.mubr.f32.vlgmr.msra.gmra.mrb[14].mxu1 %v923_v23 }
 0x38f   :  { %2467 = vmatpush3.bf16.msra.mxu1 %v2464_v26 }
 0x390   :  { %2469 = vmatprep.subr.bf16.mxu1 %v2468_v29 }
 0x393   :  { %2471 = vmatpush3.bf16.msra.mxu1 %v2468_v29 }
 0x394   :  { %2473 = vmatprep.subr.bf16.mxu1 %v2472_v32 }
 0x397   :  { %2475 = vmatpush3.bf16.msra.mxu1 %v2472_v32  ;;  %v1267_v32 = vld [vmem:[#allocation11 + $0x20] sm:$0xff] }
 0x398   :  { %2477 = vmatprep.subr.bf16.mxu1 %v2476_v34 }
 0x39b   :  { %2479 = vmatpush3.bf16.msra.mxu1 %v2476_v34  ;;  %v1272_v34 = vld [vmem:[#allocation11 + $0x48] sm:$0xff] }
 0x39c   :  { %2481 = vmatprep.subr.bf16.mxu1 %v2480_v36 }
 0x39f   :  { %2483 = vmatpush3.bf16.msra.mxu1 %v2480_v36  ;;  %v1275_v36 = vld [vmem:[#allocation11 + $0x60] sm:$0xff] }
 0x3a0   :  { %2485 = vmatprep.subr.bf16.mxu1 %v2484_v39  ;;  %v2520_v38 = vpack.c.bf16 %v1276_v37, %v1275_v36 }
 0x3a3   :  { %2487 = vmatpush3.bf16.msra.mxu1 %v2484_v39  ;;  %v1278_v39 = vld [vmem:[#allocation11 + $0x78] sm:$0xff] }
 0x3a4   :  { %2489 = vmatprep.subr.bf16.mxu1 %v2488_v43 }
 0x3a7   :  { %2491 = vmatpush3.bf16.msra.mxu1 %v2488_v43  ;;  %v2528_v43 = vpack.c.bf16 %v1468_v42, %v1467_v41 }
 0x3a8   :  { %2493 = vmatprep.subr.bf16.mxu1 %v2492_v45 }
 0x3ab   :  { %2495 = vmatpush3.bf16.msra.mxu1 %v2492_v45 }
 0x441   :  { %v990_v50 = vpop.f32.mrb[12].mxu1 }
 0x442   :  { %v2112_v56 = vpop.f32.mrb[13].mxu1  ;;  %v1064_v57 = vmul.f32 0.001953125, %v990_v50 }
 0x444   :  { %v1066_v62 = vmul.f32 %v1064_v57, %v1064_v57 }
 0x461   :  { %v1060_v61 = vpop.f32.mrb[14].mxu1 }
 0x462   :  { %v1065_v2 = vmul.f32 0.001953125, %v1060_v61  ;;  %v2147_v4 = vpop.f32.mrb[15].mxu1  ;;  %v1470_v61 = vld [vmem:[#allocation11 + $0x118] sm:$0xff] }
 0x464   :  { %v1067_v5 = vsub.f32 %v1065_v2, %v1066_v62 }
 0x466   :  { %v1068_v6 = vadd.f32 1e-05, %v1067_v5  ;;  %v1471_v5 = vld [vmem:[#allocation11 + $0x120] sm:$0xff] }
 0x468   :  { %2619 = vrsqrt.f32 %v1068_v6  ;;  %v1472_v6 = vld [vmem:[#allocation11 + $0x128] sm:$0xff] }
 0x472   :  { %v2620_v12 = vpop.eup %2619 }
 0x473   :  { %v1070_v13 = vmul.f32 %v2620_v12, %v146_v8  ;;  %v2536_v12 = vpack.c.bf16 %v1472_v6, %v1471_v5 }
 0x475   :  { %v1071_v15 = vmul.f32 %v1070_v13, %v1064_v57  ;;  %v1076_v16 = vrot.slane %v1070_v13, %v3045_v18  ;;  %v1469_v57 = vld [vmem:[#allocation11 + $0x110] sm:$0xff] }
 0x476   :  { %v2532_v4 = vpack.c.bf16 %v1470_v61, %v1469_v57 }
 0x477   :  { %v1072_v17 = vsub.f32 %v147_v14, %v1071_v15  ;;  %v1077_v19 = vmul.f32 %v1076_v16, %v3120_v47  ;;  %v1078_v20 = vmul.f32 %v1076_v16, %v3118_v46  ;;  %v1079_v63 = vmul.f32 %v1076_v16, %v3124_v58  ;;  %v1264_v46 = vld [vmem:[#allocation11 + $0x8] sm:$0xff]  ;;  %v1265_v58 = vld [vmem:[#allocation11 + $0x10] sm:$0xff]  ;;  %v1474_v15 = vld [vmem:[#allocation11 + $0x138] sm:$0xff] }
 0x478   :  { %v1080_v1 = vmul.f32 %v1076_v16, %v3126_v59  ;;  %v1266_v59 = vld [vmem:[#allocation11 + $0x18] sm:$0xff]  ;;  %v1473_v14 = vld [vmem:[#allocation11 + $0x130] sm:$0xff] }
 0x479   :  { %v1084_v21 = vrot.slane %v1072_v17, %v3045_v18  ;;  %v1263_v18 = vld [vmem:[#allocation11] sm:$0xff]  ;;  %v2500_v31 = vpack.c.bf16 %v1266_v59, %v1265_v58  ;;  %v2540_v17 = vpack.c.bf16 %v1474_v15, %v1473_v14  ;;  %v1582_v58 = vld [vmem:[#allocation13 + $0x10] sm:$0xff]  ;;  %v1583_v59 = vld [vmem:[#allocation13 + $0x18] sm:$0xff] }
 0x47a   :  { %v2496_v47 = vpack.c.bf16 %v1264_v46, %v1263_v18  ;;  %v1580_v18 = vld [vmem:[#allocation13] sm:$0xff]  ;;  %v1581_v46 = vld [vmem:[#allocation13 + $0x8] sm:$0xff] }
 0x47b   :  { %v1085_v22 = vadd.f32 %v1084_v21, %v1077_v19  ;;  %v1086_v3 = vadd.f32 %v1084_v21, %v1078_v20  ;;  %v1087_v23 = vadd.f32 %v1084_v21, %v1079_v63  ;;  %v1088_v24 = vadd.f32 %v1084_v21, %v1080_v1  ;;  %v1475_v20 = vld [vmem:[#allocation11 + $0x140] sm:$0xff]  ;;  %v1476_v21 = vld [vmem:[#allocation11 + $0x148] sm:$0xff] }
 0x47c   :  { %v2544_v1 = vpack.c.bf16 %v1476_v21, %v1475_v20 }
 0x47d   :  { %v1089_v25 = vmax.f32 %v1085_v22, 0.0  ;;  %v1090_v26 = vmax.f32 %v1086_v3, 0.0  ;;  %v1091_v27 = vmax.f32 %v1087_v23, 0.0  ;;  %v1092_v28 = vmax.f32 %v1088_v24, 0.0  ;;  %v1477_v3 = vld [vmem:[#allocation11 + $0x150] sm:$0xff]  ;;  %v1478_v23 = vld [vmem:[#allocation11 + $0x158] sm:$0xff] }
 0x47e   :  { %v2548_v24 = vpack.c.bf16 %v1478_v23, %v1477_v3 }
 0x47f   :  { %v2448_v29 = vpack.c.bf16 %v1090_v26, %v1089_v25  ;;  %2208 = vmatprep.mubr.f32.mxu1 %v1089_v25  ;;  %v2452_v30 = vpack.c.bf16 %v1092_v28, %v1091_v27  ;;  %v1479_v25 = vld [vmem:[#allocation11 + $0x160] sm:$0xff] }
 0x480   :  { %2209 = vmatmul.mubr.f32.vlgmr.msra.gmra.mrb[16].mxu1 %v1090_v26  ;;  %v1480_v26 = vld [vmem:[#allocation11 + $0x168] sm:$0xff] }
 0x481   :  { %2449 = vmatprep.subr.bf16.mxu0 %v2448_v29  ;;  %2211 = vmatprep.mubr.f32.mxu1 %v1091_v27  ;;  %v2552_v27 = vpack.c.bf16 %v1480_v26, %v1479_v25 }
 0x482   :  { %2451 = vmatpush3.bf16.msra.mxu0 %v2448_v29 }
 0x483   :  { %2453 = vmatprep.subr.bf16.mxu0 %v2452_v30 }
 0x484   :  { %2212 = vmatmul.mubr.f32.gmra.mrb[18].mxu1 %v1092_v28  ;;  %v1481_v28 = vld [vmem:[#allocation11 + $0x170] sm:$0xff] }
 0x486   :  { %2455 = vmatpush3.bf16.msra.mxu0 %v2452_v30 }
 0x487   :  { %2457 = vmatprep.subr.bf16.mxu0 %v2448_v29 }
 0x489   :  { %2157 = vmatmul.mubr.msk.f32.vlgmr.msra.gmra.mrb[4].mxu0 %vm362_vm2, %v3060_v48  ;;  %v2504_v48 = vpack.c.bf16 %v1268_v0, %v1267_v32  ;;  %v1584_v32 = vld [vmem:[#allocation13 + $0x20] sm:$0xff]  ;;  %v1585_v0 = vld [vmem:[#allocation13 + $0x28] sm:$0xff] }
 0x48a   :  { %2459 = vmatpush3.bf16.msra.mxu0 %v2448_v29  ;;  %2159 = vmatprep.mubr.msk.f32.mxu0 %vm362_vm2, %v3062_v49  ;;  %v1269_v49 = vld [vmem:[#allocation11 + $0x30] sm:$0xff]  ;;  %v1482_v29 = vld [vmem:[#allocation11 + $0x178] sm:$0xff] }
 0x48b   :  { %2461 = vmatprep.subr.bf16.mxu0 %v2452_v30 }
 0x48d   :  { %2160 = vmatmul.mubr.msk.f32.gmra.mrb[6].mxu0 %vm362_vm2, %v3068_v51  ;;  %v2508_v51 = vpack.c.bf16 %v1270_v33, %v1269_v49  ;;  %v1586_v49 = vld [vmem:[#allocation13 + $0x30] sm:$0xff]  ;;  %v1587_v33 = vld [vmem:[#allocation13 + $0x38] sm:$0xff] }
 0x48e   :  { %2463 = vmatpush3.bf16.msra.mxu0 %v2452_v30  ;;  %2170 = vmatprep.mubr.msk.f32.mxu0 %vm362_vm2, %v3070_v52  ;;  %v1271_v52 = vld [vmem:[#allocation11 + $0x40] sm:$0xff]  ;;  %v2556_v30 = vpack.c.bf16 %v1482_v29, %v1481_v28 }
 0x48f   :  { %2497 = vmatprep.subr.bf16.mxu0 %v2496_v47  ;;  %v2512_v35 = vpack.c.bf16 %v1272_v34, %v1271_v52  ;;  %v1748_v52 = vld [vmem:[%s3224_s8 + $0x1] ss:$0 sm:$0xff] }
 0x491   :  { %2171 = vmatmul.mubr.msk.f32.vlgmr.msra.gmra.mrb[8].mxu0 %vm362_vm2, %v3076_v53  ;;  %v1273_v53 = vld [vmem:[#allocation11 + $0x50] sm:$0xff] }
 0x492   :  { %2173 = vmatprep.mubr.msk.f32.mxu0 %vm362_vm2, %v3078_v54  ;;  %2499 = vmatpush3.bf16.msra.mxu0 %v2496_v47  ;;  %v2516_v54 = vpack.c.bf16 %v1274_v60, %v1273_v53  ;;  %v2560_v47 = vpack.c.bf16 %v1581_v46, %v1580_v18 }
 0x493   :  { %2501 = vmatprep.subr.bf16.mxu0 %v2500_v31 }
 0x495   :  { %2174 = vmatmul.mubr.msk.f32.gmra.mrb[10].mxu0 %vm362_vm2, %v3085_v55  ;;  %v1277_v55 = vld [vmem:[#allocation11 + $0x70] sm:$0xff] }
 0x496   :  { %2503 = vmatpush3.bf16.msra.mxu0 %v2500_v31  ;;  %v2524_v40 = vpack.c.bf16 %v1278_v39, %v1277_v55  ;;  %v2564_v31 = vpack.c.bf16 %v1583_v59, %v1582_v58 }
 0x497   :  { %2505 = vmatprep.subr.bf16.mxu0 %v2504_v48 }
 0x49a   :  { %2507 = vmatpush3.bf16.msra.mxu0 %v2504_v48  ;;  %v2568_v48 = vpack.c.bf16 %v1585_v0, %v1584_v32 }
 0x49b   :  { %2509 = vmatprep.subr.bf16.mxu0 %v2508_v51 }
 0x49e   :  { %2511 = vmatpush3.bf16.msra.mxu0 %v2508_v51  ;;  %v2572_v51 = vpack.c.bf16 %v1587_v33, %v1586_v49 }
 0x49f   :  { %2513 = vmatprep.subr.bf16.mxu0 %v2512_v35 }
 0x4a2   :  { %2515 = vmatpush3.bf16.msra.mxu0 %v2512_v35 }
 0x4a3   :  { %2517 = vmatprep.subr.bf16.mxu0 %v2516_v54 }
 0x4a6   :  { %2519 = vmatpush3.bf16.msra.mxu0 %v2516_v54 }
 0x4a7   :  { %2521 = vmatprep.subr.bf16.mxu0 %v2520_v38 }
 0x4aa   :  { %2523 = vmatpush3.bf16.msra.mxu0 %v2520_v38 }
 0x4ab   :  { %2525 = vmatprep.subr.bf16.mxu0 %v2524_v40 }
 0x4ae   :  { %2527 = vmatpush3.bf16.msra.mxu0 %v2524_v40 }
 0x4af   :  { %2529 = vmatprep.subr.bf16.mxu0 %v2528_v43 }
 0x553   :  { %v3175_v44 = vpop.f32.mrb[16].mxu1 }
 0x554   :  { %v3177_v45 = vpop.f32.mrb[17].mxu1 }
 0x555   :  { %v2579_v35 = vadd.f32 %v1748_v52, %v3177_v45 }
 0x557   :  { %v3179_v50 = vpop.f32.mrb[18].mxu1 }
 0x558   :  { %v3181_v56 = vpop.f32.mrb[19].mxu1  ;;  %v2582_v34 = vadd.f32 %v3179_v50, %v1748_v52 }
 0x559   :  { %v2585_v53 = vadd.f32 %v1748_v52, %v3181_v56 }
 0x55c   :  { %v2158_v62 = vpop.f32.mrb[4].mxu0 }
 0x55d   :  { %v1159_v2 = vpop.f32.mrb[5].mxu0 }
 0x55e   :  { %2246 = vmatprep.mubr.f32.mxu0 %v1159_v2 }
 0x55f   :  { %2247 = vmatmul.mubr.f32.vlgmr.msra.gmra.mrb[12].mxu0 %v2158_v62 }
 0x560   :  { %2531 = vmatpush3.bf16.msra.mxu0 %v2528_v43  ;;  %v2161_v8 = vpop.f32.mrb[6].mxu0 }
 0x561   :  { %2533 = vmatprep.subr.bf16.mxu0 %v2532_v4  ;;  %v1169_v13 = vpop.f32.mrb[7].mxu0 }
 0x562   :  { %2249 = vmatprep.mubr.f32.mxu0 %v1169_v13 }
 0x563   :  { %2250 = vmatmul.mubr.f32.gmra.mrb[14].mxu0 %v2161_v8 }
 0x564   :  { %2535 = vmatpush3.bf16.msra.mxu0 %v2532_v4  ;;  %v2172_v16 = vpop.f32.mrb[8].mxu0 }
 0x565   :  { %2537 = vmatprep.subr.bf16.mxu0 %v2536_v12  ;;  %v1244_v19 = vpop.f32.mrb[9].mxu0 }
 0x566   :  { %2284 = vmatprep.mubr.f32.mxu0 %v1244_v19 }
 0x568   :  { %2539 = vmatpush3.bf16.msra.mxu0 %v2536_v12  ;;  %v2175_v63 = vpop.f32.mrb[10].mxu0 }
 0x569   :  { %2541 = vmatprep.subr.bf16.mxu0 %v2540_v17  ;;  %v1254_v22 = vpop.f32.mrb[11].mxu0 }
 0x56c   :  { %2543 = vmatpush3.bf16.msra.mxu0 %v2540_v17 }
 0x56d   :  { %2545 = vmatprep.subr.bf16.mxu0 %v2544_v1 }
 0x570   :  { %2547 = vmatpush3.bf16.msra.mxu0 %v2544_v1 }
 0x571   :  { %2549 = vmatprep.subr.bf16.mxu0 %v2548_v24 }
 0x574   :  { %2551 = vmatpush3.bf16.msra.mxu0 %v2548_v24 }
 0x575   :  { %2553 = vmatprep.subr.bf16.mxu0 %v2552_v27 }
 0x578   :  { %2555 = vmatpush3.bf16.msra.mxu0 %v2552_v27 }
 0x579   :  { %2557 = vmatprep.subr.bf16.mxu0 %v2556_v30 }
 0x57c   :  { %2559 = vmatpush3.bf16.msra.mxu0 %v2556_v30 }
 0x57d   :  { %2561 = vmatprep.subr.bf16.mxu0 %v2560_v47 }
 0x57f   :  { %2285 = vmatmul.mubr.f32.vlgmr.msra.gmra.mrb[12].mxu0 %v2172_v16 }
 0x580   :  { %2563 = vmatpush3.bf16.msra.mxu0 %v2560_v47  ;;  %2287 = vmatprep.mubr.f32.mxu0 %v1254_v22 }
 0x581   :  { %2565 = vmatprep.subr.bf16.mxu0 %v2564_v31 }
 0x583   :  { %2288 = vmatmul.mubr.f32.gmra.mrb[14].mxu0 %v2175_v63 }
 0x584   :  { %2567 = vmatpush3.bf16.msra.mxu0 %v2564_v31  ;;  %2306 = vmatprep.mubr.msk.f32.mxu0 %vm156_vm1, %v2999_v7  ;;  %v2576_v7 = vadd.f32 %v3175_v44, %v1748_v52 }
 0x585   :  { %2569 = vmatprep.subr.bf16.mxu0 %v2568_v48 }
 0x588   :  { %2571 = vmatpush3.bf16.msra.mxu0 %v2568_v48 }
 0x589   :  { %2573 = vmatprep.subr.bf16.mxu0 %v2572_v51 }
 0x58c   :  { %2575 = vmatpush3.bf16.msra.mxu0 %v2572_v51 }
 0x58f   :  { %2307 = vmatmul.mubr.msk.f32.vlgmr.msra.gmra.mrb[12].mxu0 %vm156_vm1, %v3001_v9  ;;  %v1749_v9 = vld [vmem:[%s3224_s8 + $0x2] ss:$0 sm:$0xff] }
 0x590   :  { %2309 = vmatprep.mubr.msk.f32.mxu0 %vm156_vm1, %v3003_v10  ;;  %v2583_v37 = vadd.f32 %v2582_v34, %v1749_v9  ;;  %v2586_v39 = vadd.f32 %v2585_v53, %v1749_v9 }
 0x593   :  { %2310 = vmatmul.mubr.msk.f32.gmra.mrb[14].mxu0 %vm156_vm1, %v3005_v11 }
 0x662   :  { %v2308_v60 = vpop.f32.mrb[12].mxu0 }
 0x663   :  { %v2577_v10 = vadd.f32 %v2576_v7, %v2308_v60  ;;  %v1670_v54 = vpop.f32.mrb[13].mxu0 }
 0x664   :  { %v2580_v11 = vadd.f32 %v2579_v35, %v1670_v54 }
 0x665   :  { %v2578_v36 = vadd.f32 %v2577_v10, %v1749_v9 }
 0x666   :  { %v2581_v38 = vadd.f32 %v2580_v11, %v1749_v9  ;;  %v2311_v55 = vpop.f32.mrb[14].mxu0 }
 0x667   :  { %1694 = vst [vmem:[#allocation14 + $0x8] sm:$0xff] %v2578_v36  ;;  %v2584_v40 = vadd.f32 %v2583_v37, %v2311_v55  ;;  %v1680_v41 = vpop.f32.mrb[15].mxu0 }
 0x668   :  { %1693 = vst [vmem:[#allocation14] sm:$0xff] %v2581_v38  ;;  %v2587_v42 = vadd.f32 %v2586_v39, %v1680_v41 }
 0x669   :  { %1696 = vst [vmem:[#allocation14 + $0x18] sm:$0xff] %v2584_v40 }
 0x66a   :  { %1695 = vst [vmem:[#allocation14 + $0x10] sm:$0xff] %v2587_v42 }
 0x66b   :  { %2786 = shalt.err (!%p2783_p4)
}
 0x66c   :  { %s2787_s23 = scalar_lea.hbm %s3225_s9, 512 }
 0x66d   :  { %p2788_p5 = scmp.ne.s32.totalorder %s3225_s9, %s2787_s23  ;;  %p2791_p6 = scmp.lt.u32.totalorder %s2787_s23, %s3225_s9 }
 0x66f   :  { %p2793_p7 = pnand %p2791_p6, %p2788_p5 }
 0x671   :  { %2796 = shalt.err (!%p2793_p7)
}
 0x672   :  { %1708 = dma.vmem_to_hbm [thread:$0]  %s1703_s16, 512, %s3225_s9, [#allocation4], %s2809_s21, %s2809_s21, %s2810_s22  }
 0x673   :  { %2805 = dma.done.wait [#allocation4], 512  }
 0x674   :  { %2806 = vsyncadd [#allocation4], 4294966784 }
 0x675   :  { %1712 = vsyncpa [#allocation3], 1 }
 0x676   :  { %1713 = vsyncpa [#allocation6], 1 }
 0x677   :  { %1714 = vsyncpa [#allocation9], 1 }
 0x678   :  { %1715 = vsyncpa [#allocation12], 1 }
 0x679   :  { %1716 = vsyncpa [#allocation4], 1 }

</bundles_post_ra>
